<compile_context>
chip_gen: v7x
topology: tpu7x:2x2x1
jax: 0.10.0
libtpu: 0.0.40
codegen_flags: <defaults>
</compile_context>

<pallas_src>
import functools

import jax
import jax.numpy as jnp
from jax.experimental import pallas as pl
from jax.experimental.pallas import tpu as pltpu


LANES = 512  # lane-dense last dim (multiple of 128)


def _device_kind():
    try:
        return jax.devices()[0].device_kind.lower()
    except Exception:
        return ""


def _max_block_rows(kind):
    # v5e: 16 MiB scoped-VMEM default -> 1024-row (2 MiB f32) blocks so
    # double-buffered inputs (2 inputs x 2 bufs x 2 MiB = 8 MiB) fit cleanly.
    # v6e/v7x: 2048-row (4 MiB f32) blocks; 16 MiB of double-buffered input
    # fits the 32 MiB scoped default now that the accumulator is tiny.
    return 1024 if "v5" in kind else 2048


def _num_tensorcores(kind):
    # v7x has 2 TensorCores per chip; v5e / v6e have 1 (no megacore win).
    return 2 if "v7" in kind else 1


def _bce_block_kernel(x_ref, y_ref, o_ref, acc_ref, *,
                      inner, block_rows, full_rows, rem,
                      first_masked_block, need_mask):
    """Accumulate stable BCE-with-logits into a (1, LANES) per-lane partial."""
    p = pl.program_id(0)
    i = pl.program_id(1)
    bidx = p * inner + i  # un-clamped block index (clamped only in index_map)

    @pl.when(i == 0)
    def _init():
        acc_ref[...] = jnp.zeros_like(acc_ref)

    x = x_ref[...].astype(jnp.float32)
    y = y_ref[...].astype(jnp.float32)

    # Numerically stable BCE-with-logits (pos_weight = 1):
    #   l = max(x, 0) - x*y + log1p(exp(-|x|))
    loss = jnp.maximum(x, 0.0) - x * y + jnp.log1p(jnp.exp(-jnp.abs(x)))

    if need_mask:
        # Interior blocks: every element valid -> plain sublane reduce.
        @pl.when(bidx < first_masked_block)
        def _interior():
            acc_ref[...] += jnp.sum(loss, axis=0, keepdims=True)

        # Edge blocks: zero out padded-tail elements, the padded part of a
        # partial last block, and fully-masked clamped duplicate blocks.
        @pl.when(bidx >= first_masked_block)
        def _edge():
            row_ids = jax.lax.broadcasted_iota(jnp.int32, loss.shape, 0)
            lane_ids = jax.lax.broadcasted_iota(jnp.int32, loss.shape, 1)
            grow = bidx * block_rows + row_ids
            mask = (grow < full_rows) | ((grow == full_rows) & (lane_ids < rem))
            masked = jnp.where(mask, loss, 0.0)
            acc_ref[...] += jnp.sum(masked, axis=0, keepdims=True)
    else:
        acc_ref[...] += jnp.sum(loss, axis=0, keepdims=True)

    @pl.when(i == pl.num_programs(1) - 1)
    def _finalize():
        # Single cross-lane reduce per split, in the epilogue only.
        o_ref[...] = jnp.sum(acc_ref[...], axis=1, keepdims=True)


def bce_with_logits_loss(output, label):
    """Mean BCEWithLogitsLoss over all elements (pos_weight = 1.0)."""
    assert output.shape == label.shape
    n_elem = output.size

    kind = _device_kind()
    max_block_rows = _max_block_rows(kind)
    n_tc = _num_tensorcores(kind)

    # Keep inputs in their native dtype (bf16 stays bf16 on the wire); the
    # in-kernel astype(float32) does the upcast on-chip.
    flat_x = output.reshape(-1)
    flat_y = label.reshape(-1)

    rows = (n_elem + LANES - 1) // LANES
    padded = rows * LANES - n_elem
    if padded:
        # Rare fallback: N not a multiple of the lane width. Zero-pad the tail
        # (the in-kernel edge mask excludes padded elements from the sum).
        flat_x = jnp.pad(flat_x, (0, padded))
        flat_y = jnp.pad(flat_y, (0, padded))

    x2d = flat_x.reshape(rows, LANES)
    y2d = flat_y.reshape(rows, LANES)

    if rows <= max_block_rows:
        block_rows = rows            # single block covering the whole slab
        nb = 1
    else:
        block_rows = max_block_rows  # multiple of 16 -> valid bf16/f32 tiling
        nb = (rows + block_rows - 1) // block_rows

    # Size-2 "parallel" leading axis only on multi-TensorCore chips (v7x).
    nsplit = 2 if (n_tc >= 2 and nb >= 2) else 1
    inner = (nb + nsplit - 1) // nsplit

    full_rows = n_elem // LANES      # fully-valid rows
    rem = n_elem % LANES             # valid lanes in the last (partial) row
    # First block index containing any invalid / padded / duplicated element.
    first_masked_block = n_elem // (block_rows * LANES)
    need_mask = first_masked_block < nsplit * inner

    kernel = functools.partial(
        _bce_block_kernel,
        inner=inner, block_rows=block_rows,
        full_rows=full_rows, rem=rem,
        first_masked_block=first_masked_block, need_mask=need_mask)

    def in_map(p, i):
        # Clamp so an overhanging block re-reads the last real block; its
        # contribution is zeroed by the in-kernel edge mask.
        return (jnp.minimum(p * inner + i, nb - 1), 0)

    partials = pl.pallas_call(
        kernel,
        out_shape=jax.ShapeDtypeStruct((nsplit, 1), jnp.float32),
        grid_spec=pltpu.PrefetchScalarGridSpec(
            num_scalar_prefetch=0,
            grid=(nsplit, inner),
            in_specs=[
                pl.BlockSpec((block_rows, LANES), in_map),
                pl.BlockSpec((block_rows, LANES), in_map),
            ],
            out_specs=pl.BlockSpec((1, 1), lambda p, i: (p, 0)),
            scratch_shapes=[pltpu.VMEM((1, LANES), jnp.float32)],
        ),
        compiler_params=pltpu.CompilerParams(
            dimension_semantics=("parallel", "arbitrary"),
        ),
    )(x2d, y2d)

    return jnp.sum(partials) / n_elem


class CVPRlossJAX:
    """JAX/Pallas counterpart of the PyTorch CVPRloss module.

    Only bcelogloss (BCEWithLogitsLoss, pos_weight=1.0) is used in forward;
    the other loss members declared in __init__ are never invoked.
    """

    def __call__(self, output, label):
        return bce_with_logits_loss(output, label)


def _reference_bce_logits(output, label):
    x = output.astype(jnp.float32)
    y = label.astype(jnp.float32)
    loss = jnp.maximum(x, 0.0) - x * y + jnp.log1p(jnp.exp(-jnp.abs(x)))
    return jnp.mean(loss)


if __name__ == "__main__":
    key = jax.random.PRNGKey(0)
    k1, k2, k3, k4 = jax.random.split(key, 4)

    loss_fn = CVPRlossJAX()

    # Small NCHW logits and {0,1} labels, consistent with a segmentation-style
    # usage of this loss.
    shape = (2, 4, 16, 16)
    output = jax.random.normal(k1, shape, dtype=jnp.float32)
    label = (jax.random.uniform(k2, shape) > 0.5).astype(jnp.float32)

    loss = jax.block_until_ready(loss_fn(output, label))
    ref = jax.block_until_ready(_reference_bce_logits(output, label))
    assert jnp.allclose(loss, ref, rtol=1e-5, atol=1e-6), (loss, ref)

    # Ragged case (N not a multiple of the lane width) exercises the gated
    # edge-mask path.
    shape_r = (3, 5, 7)
    out_r = jax.random.normal(k3, shape_r, dtype=jnp.float32)
    lab_r = (jax.random.uniform(k4, shape_r) > 0.5).astype(jnp.float32)

    loss_r = jax.block_until_ready(loss_fn(out_r, lab_r))
    ref_r = jax.block_until_ready(_reference_bce_logits(out_r, lab_r))
    assert jnp.allclose(loss_r, ref_r, rtol=1e-5, atol=1e-6), (loss_r, ref_r)

    print("KERNEL_OK")
</pallas_src>

<mosaic_0001>
module attributes {stable_mosaic.version = 11 : i64} {
  func.func @_bce_block_kernel(%arg0: i32, %arg1: i32, %arg2: memref<4x512xf32, #tpu.memory_space<vmem>>, %arg3: memref<4x512xf32, #tpu.memory_space<vmem>>, %arg4: memref<1x1xf32, #tpu.memory_space<vmem>>, %arg5: memref<1x512xf32, #tpu.memory_space<vmem>>) attributes {dimension_semantics = [#tpu.dimension_semantics<parallel>, #tpu.dimension_semantics<arbitrary>], iteration_bounds = array<i64: 1, 1>, scalar_prefetch = 0 : i64, scratch_operands = 1 : i64, tpu.core_type = #tpu.core_type<tc>, window_params = [{transform_indices = @transform_0, window_bounds = array<i64: 4, 512>}, {transform_indices = @transform_1, window_bounds = array<i64: 4, 512>}, {transform_indices = @transform_2, window_bounds = array<i64: 1, 1>}]} {
    %c0_i32 = arith.constant 0 : i32
    %0 = arith.cmpi eq, %arg1, %c0_i32 : i32
    %1 = arith.extui %0 : i1 to i32
    %c0_i32_0 = arith.constant 0 : i32
    %2 = arith.cmpi ne, %1, %c0_i32_0 : i32
    scf.if %2 {
      %cst_12 = arith.constant 0.000000e+00 : f32
      %23 = vector.broadcast %cst_12 : f32 to vector<1x512xf32>
      %c0_13 = arith.constant 0 : index
      %c0_14 = arith.constant 0 : index
      %24 = vector.load %arg5[%c0_13, %c0_14] : memref<1x512xf32, #tpu.memory_space<vmem>>, vector<1x512xf32>
      tpu.vector_store %arg5[%c0_13, %c0_14], %23 {strides = array<i32>} : memref<1x512xf32, #tpu.memory_space<vmem>>, vector<1x512xf32>,
    } else {
    }
    %c0 = arith.constant 0 : index
    %c0_1 = arith.constant 0 : index
    %3 = vector.load %arg2[%c0, %c0_1] : memref<4x512xf32, #tpu.memory_space<vmem>>, vector<4x512xf32>
    %c0_2 = arith.constant 0 : index
    %c0_3 = arith.constant 0 : index
    %4 = vector.load %arg3[%c0_2, %c0_3] : memref<4x512xf32, #tpu.memory_space<vmem>>, vector<4x512xf32>
    %cst = arith.constant 0.000000e+00 : f32
    %5 = vector.broadcast %cst : f32 to vector<4x512xf32>
    %6 = arith.maximumf %3, %5 : vector<4x512xf32>
    %7 = arith.mulf %3, %4 : vector<4x512xf32>
    %8 = arith.subf %6, %7 : vector<4x512xf32>
    %9 = math.absf %3 : vector<4x512xf32>
    %cst_4 = arith.constant 0.000000e+00 : f32
    %10 = vector.broadcast %cst_4 : f32 to vector<4x512xf32>
    %11 = arith.subf %10, %9 : vector<4x512xf32>
    %12 = math.exp %11 : vector<4x512xf32>
    %13 = math.log1p %12 : vector<4x512xf32>
    %14 = arith.addf %8, %13 : vector<4x512xf32>
    %c0_5 = arith.constant 0 : index
    %c0_6 = arith.constant 0 : index
    %15 = vector.load %arg5[%c0_5, %c0_6] : memref<1x512xf32, #tpu.memory_space<vmem>>, vector<1x512xf32>
    %cst_7 = arith.constant dense<0.000000e+00> : vector<512xf32>
    %16 = vector.multi_reduction <add>, %14, %cst_7 [0] : vector<4x512xf32> to vector<512xf32>
    %17 = vector.shape_cast %16 : vector<512xf32> to vector<1x512xf32>
    %18 = arith.addf %15, %17 : vector<1x512xf32>
    %c0_8 = arith.constant 0 : index
    %c0_9 = arith.constant 0 : index
    %19 = vector.load %arg5[%c0_8, %c0_9] : memref<1x512xf32, #tpu.memory_space<vmem>>, vector<1x512xf32>
    tpu.vector_store %arg5[%c0_8, %c0_9], %18 {strides = array<i32>} : memref<1x512xf32, #tpu.memory_space<vmem>>, vector<1x512xf32>,
    %c0_i32_10 = arith.constant 0 : i32
    %20 = arith.cmpi eq, %arg1, %c0_i32_10 : i32
    %21 = arith.extui %20 : i1 to i32
    %c0_i32_11 = arith.constant 0 : i32
    %22 = arith.cmpi ne, %21, %c0_i32_11 : i32
    scf.if %22 {
      %c0_12 = arith.constant 0 : index
      %c0_13 = arith.constant 0 : index
      %23 = vector.load %arg5[%c0_12, %c0_13] : memref<1x512xf32, #tpu.memory_space<vmem>>, vector<1x512xf32>
      %cst_14 = arith.constant dense<0.000000e+00> : vector<1xf32>
      %24 = vector.multi_reduction <add>, %23, %cst_14 [1] : vector<1x512xf32> to vector<1xf32>
      %25 = vector.shape_cast %24 : vector<1xf32> to vector<1x1xf32>
      %c0_15 = arith.constant 0 : index
      %c0_16 = arith.constant 0 : index
      %26 = vector.load %arg4[%c0_15, %c0_16] : memref<1x1xf32, #tpu.memory_space<vmem>>, vector<1x1xf32>
      tpu.vector_store %arg4[%c0_15, %c0_16], %25 {strides = array<i32>} : memref<1x1xf32, #tpu.memory_space<vmem>>, vector<1x1xf32>,
    } else {
    }
    return
  }
  func.func @transform_0(%arg0: i32, %arg1: i32) -> (i32, i32) {
    %c1_i32 = arith.constant 1 : i32
    %0 = arith.muli %arg0, %c1_i32 : i32
    %1 = arith.addi %0, %arg1 : i32
    %c0_i32 = arith.constant 0 : i32
    %2 = arith.minsi %1, %c0_i32 : i32
    %c0_i32_0 = arith.constant 0 : i32
    %c0_i32_1 = arith.constant 0 : i32
    return %2, %c0_i32_0 : i32, i32
  }
  func.func @transform_1(%arg0: i32, %arg1: i32) -> (i32, i32) {
    %c1_i32 = arith.constant 1 : i32
    %0 = arith.muli %arg0, %c1_i32 : i32
    %1 = arith.addi %0, %arg1 : i32
    %c0_i32 = arith.constant 0 : i32
    %2 = arith.minsi %1, %c0_i32 : i32
    %c0_i32_0 = arith.constant 0 : i32
    %c0_i32_1 = arith.constant 0 : i32
    return %2, %c0_i32_0 : i32, i32
  }
  func.func @transform_2(%arg0: i32, %arg1: i32) -> (i32, i32) {
    %c0_i32 = arith.constant 0 : i32
    %c0_i32_0 = arith.constant 0 : i32
    return %arg0, %c0_i32 : i32, i32
  }
}

</mosaic_0001>

<bundles_post_ra>
// kernel: tpu_custom_call.1
= control target key start
LH: loop header
LB: loop body
LE: loop exit
PB: predicated region body
PF: predicated region fallthrough
CT: control target
= control target key end

     0   :  { %7 = vsyncpa [#allocation4], 0  ;;  %s380_s0 = inlined_call_operand.hbm [shape: f32[4,512], index: 0, kind: input, shape index: {}]   ;;  %s381_s1 = inlined_call_operand.hbm [shape: f32[4,512], index: 1, kind: input, shape index: {}]   ;;  %s382_s2 = inlined_call_operand.hbm [shape: f32[1,1], index: 2, kind: output, shape index: {}]  }
   0x1   :  { %8 = vsyncpa [#allocation7], 0 }
   0x2   :  { %9 = vsyncpa [#allocation5], 0  ;;  %s314_s9 = smov [#allocation3]   ;;  %s315_s11 = smov [#allocation6]  }
   0x3   :  { %s22_s10 = sshll.u32 %s314_s9, 4  ;;  %s38_s12 = sshll.u32 %s315_s11, 4  ;;  %s23_s10 = int_to_ptr.vmem [resolvable:$true] %s22_s10  ;;  %s39_s12 = int_to_ptr.vmem [resolvable:$true] %s38_s12 }
   0x4   :  { %s242_s15 = scalar_lea.hbm %s380_s0, 256 }
   0x5   :  { %p243_p0 = scmp.ne.s32.totalorder %s380_s0, %s242_s15  ;;  %p246_p1 = scmp.lt.u32.totalorder %s242_s15, %s380_s0 }
   0x7   :  { %p248_p2 = pnand %p246_p1, %p243_p0 }
   0x9   :  { %251 = shalt.err (!%p248_p2)
}
   0xa   :  { %s252_s20 = scalar_lea.vmem %s23_s10, 256  ;;  %p257_p4 = scmp.lt.s32.totalorder %s23_s10, %s23_s10 }
   0xb   :  { %p253_p3 = scmp.ne.s32.totalorder %s23_s10, %s252_s20  ;;  %p258_p5 = scmp.lt.s32.totalorder %s252_s20, %s252_s20 }
   0xd   :  { %p259_p6 = por %p258_p5, %p257_p4 }
   0xf   :  { %p260_p7 = pnand %p259_p6, %p253_p3 }
  0x11   :  { %263 = shalt.err (!%p260_p7)
}
  0x12   :  { %25 = dma.hbm_to_vmem [thread:$0]  %s380_s0, 256, %s23_s10, [#allocation4]  }
  0x13   :  { %s264_s25 = scalar_lea.hbm %s381_s1, 256 }
  0x14   :  { %p265_p8 = scmp.ne.s32.totalorder %s381_s1, %s264_s25  ;;  %p268_p9 = scmp.lt.u32.totalorder %s264_s25, %s381_s1 }
  0x16   :  { %p270_p10 = pnand %p268_p9, %p265_p8 }
  0x18   :  { %273 = shalt.err (!%p270_p10)
}
  0x19   :  { %s274_s30 = scalar_lea.vmem %s39_s12, 256  ;;  %p279_p12 = scmp.lt.s32.totalorder %s39_s12, %s39_s12 }
  0x1a   :  { %p275_p11 = scmp.ne.s32.totalorder %s39_s12, %s274_s30  ;;  %p280_p13 = scmp.lt.s32.totalorder %s274_s30, %s274_s30 }
  0x1c   :  { %p281_p0 = por %p280_p13, %p279_p12 }
  0x1e   :  { %p282_p1 = pnand %p281_p0, %p275_p11 }
  0x20   :  { %285 = shalt.err (!%p282_p1)
}
  0x21   :  { %41 = dma.hbm_to_vmem [thread:$0]  %s381_s1, 256, %s39_s12, [#allocation7]  }
  0x22   :  { %308 = dma.done.wait [#allocation4], 256  }
  0x23   :  { %309 = vsyncadd [#allocation4], 4294967040 }
  0x24   :  { %310 = dma.done.wait [#allocation7], 256  }
  0x25   :  { %311 = vsyncadd [#allocation7], 4294967040  ;;  %v58_v0 = vlaneseq  ;;  %v316_v2 = vmov 0.0   ;;  %v63_v3 = vld [vmem:[#allocation3] sm:$0xff]  ;;  %v64_v4 = vld [vmem:[#allocation3 + $0x8] sm:$0xff]  ;;  %vm108_vm3 = vcmask 1043456  }
  0x26   :  { %v73_v5 = vand.u32 2147483647, %v63_v3  ;;  %v74_v6 = vand.u32 2147483647, %v64_v4  ;;  %v65_v17 = vld [vmem:[#allocation6] sm:$0xff]  ;;  %v66_v18 = vld [vmem:[#allocation6 + $0x8] sm:$0xff] }
  0x27   :  { %vm359_vm0 = vcmp.lt.s32.totalorder %v58_v0, 512  ;;  %v67_v20 = vmax.f32 %v63_v3, 0.0  ;;  %v69_v21 = vmul.f32 %v65_v17, %v63_v3  ;;  %v68_v24 = vmax.f32 %v64_v4, 0.0  ;;  %s318_s1 = smov [#allocation8]  }
  0x28   :  { %62 = vst.msk [vmem:[#allocation2] sm:$0xf] %vm359_vm0, %v316_v2  ;;  %v75_v7 = vsub.f32 0.0, %v73_v5  ;;  %v76_v8 = vsub.f32 0.0, %v74_v6  ;;  %v70_v25 = vmul.f32 %v66_v18, %v64_v4  ;;  %v317_v53 = vmov 1966171168  }
  0x29   :  { %v71_v29 = vsub.f32 %v67_v20, %v69_v21  ;;  %v144_v54 = vunpack.c.l.s4 %v317_v53  ;;  %v147_v2 = vshrl.u32 %v58_v0, 7  ;;  %vm197_vm4 = vcmask 1040384   ;;  %s215_s4 = sshll.u32 %s318_s1, 4  ;;  %s216_s4 = int_to_ptr.vmem [resolvable:$true] %s215_s4 }
  0x2a   :  { %v77_v9 = vmul.f32 1.442695, %v75_v7  ;;  %v79_v10 = vmul.f32 1.442695, %v76_v8  ;;  %v72_v32 = vsub.f32 %v68_v24, %v70_v25  ;;  %vm207_vm5 = vcmask 0   ;;  %s286_s5 = scalar_lea.vmem %s216_s4, 16  ;;  %p291_p3 = scmp.lt.s32.totalorder %s216_s4, %s216_s4 }
  0x2b   :  { %v145_v63 = vunpack.c.0.s8 %v144_v54  ;;  %v179_v0 = vsub.s32 0, %v147_v2  ;;  %v183_v20 = vsub.s32 1, %v147_v2  ;;  %v187_v21 = vsub.s32 2, %v147_v2  ;;  %p287_p2 = scmp.ne.s32.totalorder %s216_s4, %s286_s5  ;;  %s290_s6 = scalar_lea.vmem %s216_s4, 32 }
  0x2c   :  { %234 = vpow2.f32 %v77_v9  ;;  %p292_p4 = scmp.lt.s32.totalorder %s290_s6, %s286_s5 }
  0x2d   :  { %236 = vpow2.f32 %v79_v10  ;;  %v148_v10 = vsub.s32 %v145_v63, %v147_v2 }
  0x2e   :  { %p293_p5 = por %p292_p4, %p291_p3 }
  0x2f   :  { %v101_v17 = vld [vmem:[#allocation2] sm:$0xf] }
  0x30   :  { %p294_p6 = pnand %p293_p5, %p287_p2 }
  0x36   :  { %v235_v11 = vpop.eup %234 }
  0x37   :  { %v237_v12 = vpop.eup %236  ;;  %v81_v13 = vadd.f32 1.0, %v235_v11  ;;  %v84_v15 = vmul.f32 -0.5, %v235_v11  ;;  %v87_v22 = vand.u32 2147483647, %v235_v11 }
  0x38   :  { %v90_v14 = vadd.f32 1.0, %v237_v12  ;;  %v93_v16 = vmul.f32 -0.5, %v237_v12  ;;  %v96_v26 = vand.u32 2147483647, %v237_v12 }
  0x39   :  { %238 = vlog2.f32 %v81_v13  ;;  %v85_v19 = vadd.f32 1.0, %v84_v15  ;;  %vm88_vm1 = vcmp.lt.f32.partialorder %v87_v22, 0.0004427343  ;;  %v191_v22 = vsub.s32 3, %v147_v2 }
  0x3a   :  { %240 = vlog2.f32 %v90_v14  ;;  %v94_v23 = vadd.f32 1.0, %v93_v16  ;;  %vm97_vm2 = vcmp.lt.f32.partialorder %v96_v26, 0.0004427343 }
  0x3b   :  { %v86_v27 = vmul.f32 %v235_v11, %v85_v19 }
  0x3c   :  { %v95_v30 = vmul.f32 %v237_v12, %v94_v23 }
  0x43   :  { %v239_v28 = vpop.eup %238 }
  0x44   :  { %v241_v31 = vpop.eup %240  ;;  %v83_v33 = vmul.f32 0.6931472, %v239_v28 }
  0x45   :  { %v92_v34 = vmul.f32 0.6931472, %v241_v31 }
  0x46   :  { %v89_v35 = vsel %vm88_vm1, %v86_v27, %v83_v33 }
  0x47   :  { %v98_v36 = vsel %vm97_vm2, %v95_v30, %v92_v34  ;;  %v99_v37 = vadd.f32 %v89_v35, %v71_v29 }
  0x48   :  { %v100_v38 = vadd.f32 %v98_v36, %v72_v32 }
  0x49   :  { %v104_v39 = vcombine.high %v99_v37, %v99_v37  ;;  %v109_v40 = vsel %vm108_vm3, %v99_v37, 0.0 }
  0x4a   :  { %v105_v41 = vcombine.high %v100_v38, %v100_v38  ;;  %v110_v42 = vrot.slane %v109_v40, 4  ;;  %v123_v43 = vsel %vm108_vm3, %v100_v38, 0.0 }
  0x4b   :  { %v116_v44 = vsel %vm108_vm3, %v104_v39, 0.0  ;;  %v124_v45 = vrot.slane %v123_v43, 4 }
  0x4c   :  { %v111_v46 = vadd.f32 %v110_v42, %v109_v40  ;;  %v117_v47 = vrot.slane %v116_v44, 4  ;;  %v130_v48 = vsel %vm108_vm3, %v105_v41, 0.0 }
  0x4d   :  { %v125_v49 = vadd.f32 %v124_v45, %v123_v43  ;;  %v131_v50 = vrot.slane %v130_v48, 4 }
  0x4e   :  { %v112_v51 = vrot.slane %v111_v46, 2  ;;  %v118_v52 = vadd.f32 %v117_v47, %v116_v44 }
  0x4f   :  { %v126_v55 = vrot.slane %v125_v49, 2  ;;  %v132_v56 = vadd.f32 %v131_v50, %v130_v48 }
  0x50   :  { %v113_v57 = vadd.f32 %v112_v51, %v111_v46  ;;  %v119_v58 = vrot.slane %v118_v52, 2 }
  0x51   :  { %v127_v59 = vadd.f32 %v126_v55, %v125_v49  ;;  %v133_v60 = vrot.slane %v132_v56, 2 }
  0x52   :  { %v114_v61 = vrot.slane %v113_v57, 1  ;;  %v120_v62 = vadd.f32 %v119_v58, %v118_v52 }
  0x53   :  { %v128_v3 = vrot.slane %v127_v59, 1  ;;  %v134_v4 = vadd.f32 %v133_v60, %v132_v56 }
  0x54   :  { %v115_v5 = vadd.f32 %v114_v61, %v113_v57  ;;  %v121_v6 = vrot.slane %v120_v62, 1 }
  0x55   :  { %v129_v7 = vadd.f32 %v128_v3, %v127_v59  ;;  %v135_v8 = vrot.slane %v134_v4, 1 }
  0x56   :  { %v122_v9 = vadd.f32 %v121_v6, %v120_v62 }
  0x57   :  { %v136_v11 = vadd.f32 %v135_v8, %v134_v4 }
  0x58   :  { %v141_v12 = vcombine.low %v115_v5, %v122_v9 }
  0x59   :  { %v142_v13 = vcombine.low %v129_v7, %v136_v11 }
  0x5a   :  { %v149_v14 = vrot.slane %v141_v12, %v148_v10 }
  0x5b   :  { %v156_v15 = vrot.slane %v142_v13, %v148_v10 }
  0x5d   :  { %v157_v16 = vcombine.low %v149_v14, %v156_v15 }
  0x5f   :  { %v164_v18 = vrot.slane %v157_v16, %v148_v10 }
  0x61   :  { %v166_v19 = vadd.f32 %v164_v18, %v101_v17 }
  0x63   :  { %171 = vst.msk [vmem:[#allocation2] sm:$0xf] %vm359_vm0, %v166_v19 }
  0x6a   :  { %v175_v23 = vld [vmem:[#allocation2] sm:$0xf] }
  0x6b   :  { %v180_v24 = vrot.slane %v175_v23, %v179_v0  ;;  %v184_v25 = vrot.slane %v175_v23, %v183_v20  ;;  %v188_v26 = vrot.slane %v175_v23, %v187_v21  ;;  %v192_v27 = vrot.slane %v175_v23, %v191_v22 }
  0x6d   :  { %v198_v28 = vsel %vm197_vm4, %v180_v24, 0.0  ;;  %v199_v29 = vsel %vm197_vm4, %v184_v25, 0.0  ;;  %v201_v30 = vsel %vm197_vm4, %v188_v26, 0.0  ;;  %v203_v32 = vsel %vm197_vm4, %v192_v27, 0.0 }
  0x6e   :  { %v200_v31 = vadd.f32 %v199_v29, %v198_v28 }
  0x70   :  { %v202_v33 = vadd.f32 %v201_v30, %v200_v31 }
  0x72   :  { %v204_v34 = vadd.f32 %v203_v32, %v202_v33 }
  0x74   :  { %205 = vadd.xlane.f32.xlu0 %v204_v34 }
 0x101   :  { %v206_v1 = vpop.xlane.xlu0 %205 }
 0x102   :  { %208 = vst.msk [vmem:[#allocation8] sm:$0x1] %vm207_vm5, %v206_v1 }
 0x103   :  { %297 = shalt.err (!%p294_p6)
}
 0x104   :  { %s298_s9 = scalar_lea.hbm %s382_s2, 16 }
 0x105   :  { %p299_p7 = scmp.ne.s32.totalorder %s382_s2, %s298_s9  ;;  %p302_p8 = scmp.lt.u32.totalorder %s298_s9, %s382_s2 }
 0x107   :  { %p304_p9 = pnand %p302_p8, %p299_p7 }
 0x109   :  { %307 = shalt.err (!%p304_p9)
}
 0x10a   :  { %218 = dma.vmem_to_hbm [thread:$0]  %s216_s4, 16, %s382_s2, [#allocation5]  }
 0x10b   :  { %312 = dma.done.wait [#allocation5], 16  }
 0x10c   :  { %313 = vsyncadd [#allocation5], 4294967280 }
 0x10d   :  { %222 = vsyncpa [#allocation4], 1 }
 0x10e   :  { %223 = vsyncpa [#allocation7], 1 }
 0x10f   :  { %224 = vsyncpa [#allocation5], 1 }

</bundles_post_ra>
